<compile_context>
chip_gen: v7x
topology: tpu7x:2x2x1
jax: 0.10.0
libtpu: 0.0.40
codegen_flags: <defaults>
</compile_context>

<pallas_src>
import functools

import jax
import jax.numpy as jnp
from jax.experimental import pallas as pl
from jax.experimental.pallas import tpu as pltpu

LANE_PAD = 128  # lane-dense padding for head widths / output


# ----------------------------------------------------------------------------
# Fused kernel: conv3x3 + ReLU + global-average-pool + (Linear -> Linear) head
# ----------------------------------------------------------------------------
def _fused_kernel(x_ref, cw_ref, cb_ref, w1_ref, b1_ref, w2_ref, b2_ref,
                  out_ref, acc_ref, *, tile_h, width, c_in, c_out, inv_hw):
    # x_ref  : (tile_h+2, width+2, c_in)  bf16   halo'd input tile
    # cw_ref : (9, c_in, c_out)           bf16   conv weight (per 3x3 tap)
    # cb_ref : (1, c_out)                 f32
    # w1_ref : (c_out, OUT_PAD)           bf16   base classifier Linear
    # b1_ref : (1, OUT_PAD)               f32
    # w2_ref : (OUT_PAD, NUM_PAD)         bf16   self.fc Linear
    # b2_ref : (1, NUM_PAD)               f32
    # out_ref: (1, NUM_PAD)               f32
    # acc_ref: (1, c_out)                 f32    spatial-sum accumulator
    i = pl.program_id(1)

    @pl.when(i == 0)
    def _():
        acc_ref[...] = jnp.zeros_like(acc_ref)

    x = x_ref[...]                                       # bf16 halo tile
    y = jnp.zeros((tile_h * width, c_out), jnp.float32)
    # 3x3 conv as 9 accumulated dots over shifted slices (no im2col in HBM).
    for k in range(9):
        ki, kj = divmod(k, 3)
        xs = x[ki:ki + tile_h, kj:kj + width, :].reshape(tile_h * width, c_in)
        y = y + jnp.dot(xs, cw_ref[k], preferred_element_type=jnp.float32)

    y = jnp.maximum(y + cb_ref[...], 0.0)                # bias + ReLU (f32)
    acc_ref[...] += jnp.sum(y, axis=0, keepdims=True)    # partial spatial sum

    @pl.when(i == pl.num_programs(1) - 1)
    def _():
        pooled = acc_ref[...] * inv_hw                   # (1, c_out) f32 mean
        h1 = jnp.dot(pooled.astype(jnp.bfloat16), w1_ref[...],
                     preferred_element_type=jnp.float32) + b1_ref[...]
        logits = jnp.dot(h1.astype(jnp.bfloat16), w2_ref[...],
                         preferred_element_type=jnp.float32) + b2_ref[...]
        out_ref[...] = logits                            # lane-dense (1, 128)


# ----------------------------------------------------------------------------
# Wrapper: layout plumbing + pallas_call
# ----------------------------------------------------------------------------
def classifier_forward(x_nchw, params, num_classes, tile_h=8):
    n, c_in, h, w = x_nchw.shape
    c_out = params["conv_w"].shape[-1]
    out_pad = params["base_fc_w"].shape[-1]
    num_pad = params["fc_w"].shape[-1]
    assert h % tile_h == 0
    n_tiles = h // tile_h

    # NCHW -> NHWC (channels on the lane axis), pad 1, cast matmul operand to bf16.
    x = jnp.transpose(x_nchw, (0, 2, 3, 1)).astype(jnp.bfloat16)
    xp = jnp.pad(x, ((0, 0), (1, 1), (1, 1), (0, 0)))
    # Halo tiles: (N, n_tiles, tile_h+2, W+2, C_in). Only a 2-row halo per tile
    # is duplicated (vs. the 9x blow-up of a materialized im2col).
    tiles = jnp.stack(
        [xp[:, i * tile_h: i * tile_h + tile_h + 2] for i in range(n_tiles)],
        axis=1)

    kernel = functools.partial(_fused_kernel, tile_h=tile_h, width=w,
                               c_in=c_in, c_out=c_out, inv_hw=1.0 / (h * w))

    grid_spec = pltpu.PrefetchScalarGridSpec(
        num_scalar_prefetch=0,
        grid=(n, n_tiles),
        in_specs=[
            # input halo tile (batch / h-tile dims squeezed)
            pl.BlockSpec((None, None, tile_h + 2, w + 2, c_in),
                         lambda b, i: (b, i, 0, 0, 0)),
            # weights / biases: full blocks, constant index map (stay resident)
            pl.BlockSpec((9, c_in, c_out), lambda b, i: (0, 0, 0)),
            pl.BlockSpec((1, c_out), lambda b, i: (0, 0)),
            pl.BlockSpec((c_out, out_pad), lambda b, i: (0, 0)),
            pl.BlockSpec((1, out_pad), lambda b, i: (0, 0)),
            pl.BlockSpec((out_pad, num_pad), lambda b, i: (0, 0)),
            pl.BlockSpec((1, num_pad), lambda b, i: (0, 0)),
        ],
        out_specs=pl.BlockSpec((None, 1, num_pad), lambda b, i: (b, 0, 0)),
        scratch_shapes=[pltpu.VMEM((1, c_out), jnp.float32)],
    )

    out = pl.pallas_call(
        kernel,
        out_shape=jax.ShapeDtypeStruct((n, 1, num_pad), jnp.float32),
        grid_spec=grid_spec,
        compiler_params=pltpu.CompilerParams(
            dimension_semantics=("parallel", "arbitrary"),
            # explicit, generation-safe budget (v7x physical VMEM is 64 MiB)
            vmem_limit_bytes=32 * 1024 * 1024),
    )(tiles,
      params["conv_w"], params["conv_b"],
      params["base_fc_w"], params["base_fc_b"],
      params["fc_w"], params["fc_b"])

    # slice the lane-padded logits back to num_classes
    return out.reshape(n, num_pad)[:, :num_classes]


# ----------------------------------------------------------------------------
# Parameters (padded bf16 kernel params + raw f32 params for the reference)
# ----------------------------------------------------------------------------
def init_params(key, c_in, c_hidden, out_features, num_classes,
                out_pad=LANE_PAD, num_pad=LANE_PAD):
    k = jax.random.split(key, 6)
    conv_w = jax.random.normal(k[0], (9, c_in, c_hidden), jnp.float32) * 0.05
    conv_b = jax.random.normal(k[1], (1, c_hidden), jnp.float32) * 0.01
    w1 = jax.random.normal(k[2], (c_hidden, out_features), jnp.float32) * 0.05
    b1 = jax.random.normal(k[3], (1, out_features), jnp.float32) * 0.01
    w2 = jax.random.normal(k[4], (out_features, num_classes), jnp.float32) * 0.05
    b2 = jax.random.normal(k[5], (1, num_classes), jnp.float32) * 0.01

    # zero-pad the head to lane-dense widths (numerics unchanged)
    w1p = jnp.zeros((c_hidden, out_pad), jnp.float32).at[:, :out_features].set(w1)
    b1p = jnp.zeros((1, out_pad), jnp.float32).at[:, :out_features].set(b1)
    w2p = jnp.zeros((out_pad, num_pad), jnp.float32).at[:out_features, :num_classes].set(w2)
    b2p = jnp.zeros((1, num_pad), jnp.float32).at[:, :num_classes].set(b2)

    kernel_params = {
        "conv_w": conv_w.astype(jnp.bfloat16),
        "conv_b": conv_b,
        "base_fc_w": w1p.astype(jnp.bfloat16),
        "base_fc_b": b1p,
        "fc_w": w2p.astype(jnp.bfloat16),
        "fc_b": b2p,
    }
    raw_params = {"conv_w": conv_w, "conv_b": conv_b,
                  "w1": w1, "b1": b1, "w2": w2, "b2": b2}
    return kernel_params, raw_params


# ----------------------------------------------------------------------------
# Pure-JAX reference (same bf16 matmul operands, f32 accumulation)
# ----------------------------------------------------------------------------
def reference_forward(x_nchw, raw, num_classes):
    n, c_in, h, w = x_nchw.shape
    c_out = raw["conv_w"].shape[-1]
    x = jnp.transpose(x_nchw, (0, 2, 3, 1)).astype(jnp.bfloat16)
    xp = jnp.pad(x, ((0, 0), (1, 1), (1, 1), (0, 0)))
    y = jnp.zeros((n, h, w, c_out), jnp.float32)
    for k in range(9):
        ki, kj = divmod(k, 3)
        xs = xp[:, ki:ki + h, kj:kj + w, :]
        y = y + jnp.einsum("nhwc,co->nhwo", xs,
                           raw["conv_w"][k].astype(jnp.bfloat16),
                           preferred_element_type=jnp.float32)
    y = jnp.maximum(y + raw["conv_b"].reshape(1, 1, 1, c_out), 0.0)
    pooled = jnp.mean(y, axis=(1, 2))
    h1 = jnp.dot(pooled.astype(jnp.bfloat16), raw["w1"].astype(jnp.bfloat16),
                 preferred_element_type=jnp.float32) + raw["b1"]
    logits = jnp.dot(h1.astype(jnp.bfloat16), raw["w2"].astype(jnp.bfloat16),
                     preferred_element_type=jnp.float32) + raw["b2"]
    return logits


if __name__ == "__main__":
    key = jax.random.PRNGKey(0)
    kx, kp = jax.random.split(key)

    # small shapes consistent with the forward: NCHW image input
    N, C_IN, H, W = 2, 4, 16, 16
    C_HIDDEN = 32          # synthetic backbone feature width
    OUT_FEATURES = 64      # base_model.classifier[-1].out_features (synthetic)
    NUM_CLASSES = 2

    x = jax.random.normal(kx, (N, C_IN, H, W), jnp.float32)
    params, raw = init_params(kp, C_IN, C_HIDDEN, OUT_FEATURES, NUM_CLASSES)

    logits = classifier_forward(x, params, NUM_CLASSES)
    jax.block_until_ready(logits)

    assert logits.shape == (N, NUM_CLASSES) and logits.dtype == jnp.float32
    ref = reference_forward(x, raw, NUM_CLASSES)
    assert jnp.allclose(logits, ref, rtol=2e-2, atol=2e-2), (logits, ref)
    print("KERNEL_OK")
</pallas_src>

<mosaic_0001>
module attributes {stable_mosaic.version = 11 : i64} {
  func.func @_fused_kernel(%arg0: i32, %arg1: i32, %arg2: memref<1x1x10x18x4xbf16, #tpu.memory_space<vmem>>, %arg3: memref<9x4x32xbf16, #tpu.memory_space<vmem>>, %arg4: memref<1x32xf32, #tpu.memory_space<vmem>>, %arg5: memref<32x128xbf16, #tpu.memory_space<vmem>>, %arg6: memref<1x128xf32, #tpu.memory_space<vmem>>, %arg7: memref<128x128xbf16, #tpu.memory_space<vmem>>, %arg8: memref<1x128xf32, #tpu.memory_space<vmem>>, %arg9: memref<1x1x128xf32, #tpu.memory_space<vmem>>, %arg10: memref<1x32xf32, #tpu.memory_space<vmem>>) attributes {dimension_semantics = [#tpu.dimension_semantics<parallel>, #tpu.dimension_semantics<arbitrary>], iteration_bounds = array<i64: 2, 2>, scalar_prefetch = 0 : i64, scratch_operands = 1 : i64, tpu.core_type = #tpu.core_type<tc>, window_params = [{transform_indices = @transform_0, window_bounds = array<i64: 1, 1, 10, 18, 4>}, {pipeline_mode = #tpu.pipeline_mode<synchronous>, transform_indices = @transform_1, window_bounds = array<i64: 9, 4, 32>}, {pipeline_mode = #tpu.pipeline_mode<synchronous>, transform_indices = @transform_2, window_bounds = array<i64: 1, 32>}, {pipeline_mode = #tpu.pipeline_mode<synchronous>, transform_indices = @transform_3, window_bounds = array<i64: 32, 128>}, {pipeline_mode = #tpu.pipeline_mode<synchronous>, transform_indices = @transform_4, window_bounds = array<i64: 1, 128>}, {pipeline_mode = #tpu.pipeline_mode<synchronous>, transform_indices = @transform_5, window_bounds = array<i64: 128, 128>}, {pipeline_mode = #tpu.pipeline_mode<synchronous>, transform_indices = @transform_6, window_bounds = array<i64: 1, 128>}, {transform_indices = @transform_7, window_bounds = array<i64: 1, 1, 128>}]} {
    %c0_i32 = arith.constant 0 : i32
    %0 = arith.cmpi eq, %arg1, %c0_i32 : i32
    %1 = arith.extui %0 : i1 to i32
    %c0_i32_0 = arith.constant 0 : i32
    %2 = arith.cmpi ne, %1, %c0_i32_0 : i32
    scf.if %2 {
      %cst_42 = arith.constant 0.000000e+00 : f32
      %73 = vector.broadcast %cst_42 : f32 to vector<1x32xf32>
      %c0_43 = arith.constant 0 : index
      %c0_44 = arith.constant 0 : index
      %74 = vector.load %arg10[%c0_43, %c0_44] : memref<1x32xf32, #tpu.memory_space<vmem>>, vector<1x32xf32>
      tpu.vector_store %arg10[%c0_43, %c0_44], %73 {strides = array<i32>} : memref<1x32xf32, #tpu.memory_space<vmem>>, vector<1x32xf32>,
    } else {
    }
    %c0 = arith.constant 0 : index
    %c0_1 = arith.constant 0 : index
    %c0_2 = arith.constant 0 : index
    %c0_3 = arith.constant 0 : index
    %c0_4 = arith.constant 0 : index
    %3 = vector.load %arg2[%c0, %c0_1, %c0_2, %c0_3, %c0_4] : memref<1x1x10x18x4xbf16, #tpu.memory_space<vmem>>, vector<1x1x10x18x4xbf16>
    %4 = vector.shape_cast %3 : vector<1x1x10x18x4xbf16> to vector<10x18x4xbf16>
    %cst = arith.constant 0.000000e+00 : f32
    %5 = vector.broadcast %cst : f32 to vector<128x32xf32>
    %6 = vector.extract_strided_slice %4 {offsets = [0, 0, 0], sizes = [8, 16, 4], strides = [1, 1, 1]} : vector<10x18x4xbf16> to vector<8x16x4xbf16>
    %7 = vector.shape_cast %6 : vector<8x16x4xbf16> to vector<128x4xbf16>
    %c0_5 = arith.constant 0 : index
    %c0_6 = arith.constant 0 : index
    %c0_7 = arith.constant 0 : index
    %8 = vector.load %arg3[%c0_5, %c0_6, %c0_7] : memref<9x4x32xbf16, #tpu.memory_space<vmem>>, vector<1x4x32xbf16>
    %9 = vector.shape_cast %8 : vector<1x4x32xbf16> to vector<4x32xbf16>
    %cst_8 = arith.constant dense<0.000000e+00> : vector<128x32xf32>
    %10 = tpu.matmul %7, %9, %cst_8 {dimension_numbers = #tpu.dot_dimension_numbers<[1], [0], [0], [1], [0, 0, 1, 1], [], []>} : vector<128x4xbf16>, vector<4x32xbf16>, vector<128x32xf32> -> vector<128x32xf32>
    %11 = arith.addf %5, %10 : vector<128x32xf32>
    %12 = vector.extract_strided_slice %4 {offsets = [0, 1, 0], sizes = [8, 16, 4], strides = [1, 1, 1]} : vector<10x18x4xbf16> to vector<8x16x4xbf16>
    %13 = vector.shape_cast %12 : vector<8x16x4xbf16> to vector<128x4xbf16>
    %c1 = arith.constant 1 : index
    %c0_9 = arith.constant 0 : index
    %c0_10 = arith.constant 0 : index
    %14 = vector.load %arg3[%c1, %c0_9, %c0_10] : memref<9x4x32xbf16, #tpu.memory_space<vmem>>, vector<1x4x32xbf16>
    %15 = vector.shape_cast %14 : vector<1x4x32xbf16> to vector<4x32xbf16>
    %cst_11 = arith.constant dense<0.000000e+00> : vector<128x32xf32>
    %16 = tpu.matmul %13, %15, %cst_11 {dimension_numbers = #tpu.dot_dimension_numbers<[1], [0], [0], [1], [0, 0, 1, 1], [], []>} : vector<128x4xbf16>, vector<4x32xbf16>, vector<128x32xf32> -> vector<128x32xf32>
    %17 = arith.addf %11, %16 : vector<128x32xf32>
    %18 = vector.extract_strided_slice %4 {offsets = [0, 2, 0], sizes = [8, 16, 4], strides = [1, 1, 1]} : vector<10x18x4xbf16> to vector<8x16x4xbf16>
    %19 = vector.shape_cast %18 : vector<8x16x4xbf16> to vector<128x4xbf16>
    %c2 = arith.constant 2 : index
    %c0_12 = arith.constant 0 : index
    %c0_13 = arith.constant 0 : index
    %20 = vector.load %arg3[%c2, %c0_12, %c0_13] : memref<9x4x32xbf16, #tpu.memory_space<vmem>>, vector<1x4x32xbf16>
    %21 = vector.shape_cast %20 : vector<1x4x32xbf16> to vector<4x32xbf16>
    %cst_14 = arith.constant dense<0.000000e+00> : vector<128x32xf32>
    %22 = tpu.matmul %19, %21, %cst_14 {dimension_numbers = #tpu.dot_dimension_numbers<[1], [0], [0], [1], [0, 0, 1, 1], [], []>} : vector<128x4xbf16>, vector<4x32xbf16>, vector<128x32xf32> -> vector<128x32xf32>
    %23 = arith.addf %17, %22 : vector<128x32xf32>
    %24 = vector.extract_strided_slice %4 {offsets = [1, 0, 0], sizes = [8, 16, 4], strides = [1, 1, 1]} : vector<10x18x4xbf16> to vector<8x16x4xbf16>
    %25 = vector.shape_cast %24 : vector<8x16x4xbf16> to vector<128x4xbf16>
    %c3 = arith.constant 3 : index
    %c0_15 = arith.constant 0 : index
    %c0_16 = arith.constant 0 : index
    %26 = vector.load %arg3[%c3, %c0_15, %c0_16] : memref<9x4x32xbf16, #tpu.memory_space<vmem>>, vector<1x4x32xbf16>
    %27 = vector.shape_cast %26 : vector<1x4x32xbf16> to vector<4x32xbf16>
    %cst_17 = arith.constant dense<0.000000e+00> : vector<128x32xf32>
    %28 = tpu.matmul %25, %27, %cst_17 {dimension_numbers = #tpu.dot_dimension_numbers<[1], [0], [0], [1], [0, 0, 1, 1], [], []>} : vector<128x4xbf16>, vector<4x32xbf16>, vector<128x32xf32> -> vector<128x32xf32>
    %29 = arith.addf %23, %28 : vector<128x32xf32>
    %30 = vector.extract_strided_slice %4 {offsets = [1, 1, 0], sizes = [8, 16, 4], strides = [1, 1, 1]} : vector<10x18x4xbf16> to vector<8x16x4xbf16>
    %31 = vector.shape_cast %30 : vector<8x16x4xbf16> to vector<128x4xbf16>
    %c4 = arith.constant 4 : index
    %c0_18 = arith.constant 0 : index
    %c0_19 = arith.constant 0 : index
    %32 = vector.load %arg3[%c4, %c0_18, %c0_19] : memref<9x4x32xbf16, #tpu.memory_space<vmem>>, vector<1x4x32xbf16>
    %33 = vector.shape_cast %32 : vector<1x4x32xbf16> to vector<4x32xbf16>
    %cst_20 = arith.constant dense<0.000000e+00> : vector<128x32xf32>
    %34 = tpu.matmul %31, %33, %cst_20 {dimension_numbers = #tpu.dot_dimension_numbers<[1], [0], [0], [1], [0, 0, 1, 1], [], []>} : vector<128x4xbf16>, vector<4x32xbf16>, vector<128x32xf32> -> vector<128x32xf32>
    %35 = arith.addf %29, %34 : vector<128x32xf32>
    %36 = vector.extract_strided_slice %4 {offsets = [1, 2, 0], sizes = [8, 16, 4], strides = [1, 1, 1]} : vector<10x18x4xbf16> to vector<8x16x4xbf16>
    %37 = vector.shape_cast %36 : vector<8x16x4xbf16> to vector<128x4xbf16>
    %c5 = arith.constant 5 : index
    %c0_21 = arith.constant 0 : index
    %c0_22 = arith.constant 0 : index
    %38 = vector.load %arg3[%c5, %c0_21, %c0_22] : memref<9x4x32xbf16, #tpu.memory_space<vmem>>, vector<1x4x32xbf16>
    %39 = vector.shape_cast %38 : vector<1x4x32xbf16> to vector<4x32xbf16>
    %cst_23 = arith.constant dense<0.000000e+00> : vector<128x32xf32>
    %40 = tpu.matmul %37, %39, %cst_23 {dimension_numbers = #tpu.dot_dimension_numbers<[1], [0], [0], [1], [0, 0, 1, 1], [], []>} : vector<128x4xbf16>, vector<4x32xbf16>, vector<128x32xf32> -> vector<128x32xf32>
    %41 = arith.addf %35, %40 : vector<128x32xf32>
    %42 = vector.extract_strided_slice %4 {offsets = [2, 0, 0], sizes = [8, 16, 4], strides = [1, 1, 1]} : vector<10x18x4xbf16> to vector<8x16x4xbf16>
    %43 = vector.shape_cast %42 : vector<8x16x4xbf16> to vector<128x4xbf16>
    %c6 = arith.constant 6 : index
    %c0_24 = arith.constant 0 : index
    %c0_25 = arith.constant 0 : index
    %44 = vector.load %arg3[%c6, %c0_24, %c0_25] : memref<9x4x32xbf16, #tpu.memory_space<vmem>>, vector<1x4x32xbf16>
    %45 = vector.shape_cast %44 : vector<1x4x32xbf16> to vector<4x32xbf16>
    %cst_26 = arith.constant dense<0.000000e+00> : vector<128x32xf32>
    %46 = tpu.matmul %43, %45, %cst_26 {dimension_numbers = #tpu.dot_dimension_numbers<[1], [0], [0], [1], [0, 0, 1, 1], [], []>} : vector<128x4xbf16>, vector<4x32xbf16>, vector<128x32xf32> -> vector<128x32xf32>
    %47 = arith.addf %41, %46 : vector<128x32xf32>
    %48 = vector.extract_strided_slice %4 {offsets = [2, 1, 0], sizes = [8, 16, 4], strides = [1, 1, 1]} : vector<10x18x4xbf16> to vector<8x16x4xbf16>
    %49 = vector.shape_cast %48 : vector<8x16x4xbf16> to vector<128x4xbf16>
    %c7 = arith.constant 7 : index
    %c0_27 = arith.constant 0 : index
    %c0_28 = arith.constant 0 : index
    %50 = vector.load %arg3[%c7, %c0_27, %c0_28] : memref<9x4x32xbf16, #tpu.memory_space<vmem>>, vector<1x4x32xbf16>
    %51 = vector.shape_cast %50 : vector<1x4x32xbf16> to vector<4x32xbf16>
    %cst_29 = arith.constant dense<0.000000e+00> : vector<128x32xf32>
    %52 = tpu.matmul %49, %51, %cst_29 {dimension_numbers = #tpu.dot_dimension_numbers<[1], [0], [0], [1], [0, 0, 1, 1], [], []>} : vector<128x4xbf16>, vector<4x32xbf16>, vector<128x32xf32> -> vector<128x32xf32>
    %53 = arith.addf %47, %52 : vector<128x32xf32>
    %54 = vector.extract_strided_slice %4 {offsets = [2, 2, 0], sizes = [8, 16, 4], strides = [1, 1, 1]} : vector<10x18x4xbf16> to vector<8x16x4xbf16>
    %55 = vector.shape_cast %54 : vector<8x16x4xbf16> to vector<128x4xbf16>
    %c8 = arith.constant 8 : index
    %c0_30 = arith.constant 0 : index
    %c0_31 = arith.constant 0 : index
    %56 = vector.load %arg3[%c8, %c0_30, %c0_31] : memref<9x4x32xbf16, #tpu.memory_space<vmem>>, vector<1x4x32xbf16>
    %57 = vector.shape_cast %56 : vector<1x4x32xbf16> to vector<4x32xbf16>
    %cst_32 = arith.constant dense<0.000000e+00> : vector<128x32xf32>
    %58 = tpu.matmul %55, %57, %cst_32 {dimension_numbers = #tpu.dot_dimension_numbers<[1], [0], [0], [1], [0, 0, 1, 1], [], []>} : vector<128x4xbf16>, vector<4x32xbf16>, vector<128x32xf32> -> vector<128x32xf32>
    %59 = arith.addf %53, %58 : vector<128x32xf32>
    %c0_33 = arith.constant 0 : index
    %c0_34 = arith.constant 0 : index
    %60 = vector.load %arg4[%c0_33, %c0_34] : memref<1x32xf32, #tpu.memory_space<vmem>>, vector<1x32xf32>
    %61 = vector.broadcast %60 : vector<1x32xf32> to vector<128x32xf32>
    %62 = arith.addf %59, %61 : vector<128x32xf32>
    %cst_35 = arith.constant 0.000000e+00 : f32
    %63 = vector.broadcast %cst_35 : f32 to vector<128x32xf32>
    %64 = arith.maximumf %62, %63 : vector<128x32xf32>
    %c0_36 = arith.constant 0 : index
    %c0_37 = arith.constant 0 : index
    %65 = vector.load %arg10[%c0_36, %c0_37] : memref<1x32xf32, #tpu.memory_space<vmem>>, vector<1x32xf32>
    %cst_38 = arith.constant dense<0.000000e+00> : vector<32xf32>
    %66 = vector.multi_reduction <add>, %64, %cst_38 [0] : vector<128x32xf32> to vector<32xf32>
    %67 = vector.shape_cast %66 : vector<32xf32> to vector<1x32xf32>
    %68 = arith.addf %65, %67 : vector<1x32xf32>
    %c0_39 = arith.constant 0 : index
    %c0_40 = arith.constant 0 : index
    %69 = vector.load %arg10[%c0_39, %c0_40] : memref<1x32xf32, #tpu.memory_space<vmem>>, vector<1x32xf32>
    tpu.vector_store %arg10[%c0_39, %c0_40], %68 {strides = array<i32>} : memref<1x32xf32, #tpu.memory_space<vmem>>, vector<1x32xf32>,
    %c1_i32 = arith.constant 1 : i32
    %70 = arith.cmpi eq, %arg1, %c1_i32 : i32
    %71 = arith.extui %70 : i1 to i32
    %c0_i32_41 = arith.constant 0 : i32
    %72 = arith.cmpi ne, %71, %c0_i32_41 : i32
    scf.if %72 {
      %c0_42 = arith.constant 0 : index
      %c0_43 = arith.constant 0 : index
      %73 = vector.load %arg10[%c0_42, %c0_43] : memref<1x32xf32, #tpu.memory_space<vmem>>, vector<1x32xf32>
      %cst_44 = arith.constant 3.906250e-03 : f32
      %74 = vector.broadcast %cst_44 : f32 to vector<1x32xf32>
      %75 = arith.mulf %73, %74 : vector<1x32xf32>
      %76 = arith.truncf %75 : vector<1x32xf32> to vector<1x32xbf16>
      %c0_45 = arith.constant 0 : index
      %c0_46 = arith.constant 0 : index
      %77 = vector.load %arg5[%c0_45, %c0_46] : memref<32x128xbf16, #tpu.memory_space<vmem>>, vector<32x128xbf16>
      %cst_47 = arith.constant dense<0.000000e+00> : vector<1x128xf32>
      %78 = tpu.matmul %76, %77, %cst_47 {dimension_numbers = #tpu.dot_dimension_numbers<[1], [0], [0], [1], [0, 0, 1, 1], [], []>} : vector<1x32xbf16>, vector<32x128xbf16>, vector<1x128xf32> -> vector<1x128xf32>
      %c0_48 = arith.constant 0 : index
      %c0_49 = arith.constant 0 : index
      %79 = vector.load %arg6[%c0_48, %c0_49] : memref<1x128xf32, #tpu.memory_space<vmem>>, vector<1x128xf32>
      %80 = arith.addf %78, %79 : vector<1x128xf32>
      %81 = arith.truncf %80 : vector<1x128xf32> to vector<1x128xbf16>
      %c0_50 = arith.constant 0 : index
      %c0_51 = arith.constant 0 : index
      %82 = vector.load %arg7[%c0_50, %c0_51] : memref<128x128xbf16, #tpu.memory_space<vmem>>, vector<128x128xbf16>
      %cst_52 = arith.constant dense<0.000000e+00> : vector<1x128xf32>
      %83 = tpu.matmul %81, %82, %cst_52 {dimension_numbers = #tpu.dot_dimension_numbers<[1], [0], [0], [1], [0, 0, 1, 1], [], []>} : vector<1x128xbf16>, vector<128x128xbf16>, vector<1x128xf32> -> vector<1x128xf32>
      %c0_53 = arith.constant 0 : index
      %c0_54 = arith.constant 0 : index
      %84 = vector.load %arg8[%c0_53, %c0_54] : memref<1x128xf32, #tpu.memory_space<vmem>>, vector<1x128xf32>
      %85 = arith.addf %83, %84 : vector<1x128xf32>
      %c0_55 = arith.constant 0 : index
      %c0_56 = arith.constant 0 : index
      %c0_57 = arith.constant 0 : index
      %86 = vector.load %arg9[%c0_55, %c0_56, %c0_57] : memref<1x1x128xf32, #tpu.memory_space<vmem>>, vector<1x1x128xf32>
      %87 = vector.shape_cast %86 : vector<1x1x128xf32> to vector<1x128xf32>
      %88 = vector.shape_cast %85 : vector<1x128xf32> to vector<1x1x128xf32>
      tpu.vector_store %arg9[%c0_55, %c0_56, %c0_57], %88 {strides = array<i32>} : memref<1x1x128xf32, #tpu.memory_space<vmem>>, vector<1x1x128xf32>,
    } else {
    }
    return
  }
  func.func @transform_0(%arg0: i32, %arg1: i32) -> (i32, i32, i32, i32, i32) {
    %c0_i32 = arith.constant 0 : i32
    %c0_i32_0 = arith.constant 0 : i32
    %c0_i32_1 = arith.constant 0 : i32
    %c0_i32_2 = arith.constant 0 : i32
    return %arg0, %arg1, %c0_i32, %c0_i32_0, %c0_i32_1 : i32, i32, i32, i32, i32
  }
  func.func @transform_1(%arg0: i32, %arg1: i32) -> (i32, i32, i32) {
    %c0_i32 = arith.constant 0 : i32
    %c0_i32_0 = arith.constant 0 : i32
    %c0_i32_1 = arith.constant 0 : i32
    %c0_i32_2 = arith.constant 0 : i32
    return %c0_i32, %c0_i32_0, %c0_i32_1 : i32, i32, i32
  }
  func.func @transform_2(%arg0: i32, %arg1: i32) -> (i32, i32) {
    %c0_i32 = arith.constant 0 : i32
    %c0_i32_0 = arith.constant 0 : i32
    %c0_i32_1 = arith.constant 0 : i32
    return %c0_i32, %c0_i32_0 : i32, i32
  }
  func.func @transform_3(%arg0: i32, %arg1: i32) -> (i32, i32) {
    %c0_i32 = arith.constant 0 : i32
    %c0_i32_0 = arith.constant 0 : i32
    %c0_i32_1 = arith.constant 0 : i32
    return %c0_i32, %c0_i32_0 : i32, i32
  }
  func.func @transform_4(%arg0: i32, %arg1: i32) -> (i32, i32) {
    %c0_i32 = arith.constant 0 : i32
    %c0_i32_0 = arith.constant 0 : i32
    %c0_i32_1 = arith.constant 0 : i32
    return %c0_i32, %c0_i32_0 : i32, i32
  }
  func.func @transform_5(%arg0: i32, %arg1: i32) -> (i32, i32) {
    %c0_i32 = arith.constant 0 : i32
    %c0_i32_0 = arith.constant 0 : i32
    %c0_i32_1 = arith.constant 0 : i32
    return %c0_i32, %c0_i32_0 : i32, i32
  }
  func.func @transform_6(%arg0: i32, %arg1: i32) -> (i32, i32) {
    %c0_i32 = arith.constant 0 : i32
    %c0_i32_0 = arith.constant 0 : i32
    %c0_i32_1 = arith.constant 0 : i32
    return %c0_i32, %c0_i32_0 : i32, i32
  }
  func.func @transform_7(%arg0: i32, %arg1: i32) -> (i32, i32, i32) {
    %c0_i32 = arith.constant 0 : i32
    %c0_i32_0 = arith.constant 0 : i32
    %c0_i32_1 = arith.constant 0 : i32
    return %arg0, %c0_i32, %c0_i32_0 : i32, i32, i32
  }
}

</mosaic_0001>

<bundles_post_ra>
// kernel: tpu_custom_call.1
= control target key start
LH: loop header
LB: loop body
LE: loop exit
PB: predicated region body
PF: predicated region fallthrough
CT: control target
= control target key end

     0   :  { %12 = vsyncpa [#allocation4], 0  ;;  %s3780_s0 = inlined_call_operand.vmem [shape: bf16[2,2,10,18,4], index: 0, kind: input, shape index: {}]   ;;  %s3781_s1 = inlined_call_operand.vmem [shape: bf16[9,4,32], index: 1, kind: input, shape index: {}]   ;;  %s3782_s2 = inlined_call_operand.vmem [shape: f32[1,32], index: 2, kind: input, shape index: {}]   ;;  %s3783_s3 = inlined_call_operand.vmem [shape: bf16[32,128], index: 3, kind: input, shape index: {}]   ;;  %s3784_s4 = inlined_call_operand.vmem [shape: f32[1,128], index: 4, kind: input, shape index: {}]   ;;  %s3785_s5 = inlined_call_operand.vmem [shape: bf16[128,128], index: 5, kind: input, shape index: {}]   ;;  %s3786_s6 = inlined_call_operand.vmem [shape: f32[1,128], index: 6, kind: input, shape index: {}]   ;;  %s3787_s7 = inlined_call_operand.hbm [shape: f32[2,1,128], index: 7, kind: output, shape index: {}]  }
   0x1   :  { %14 = vsyncpa [#allocation4 + $0x1], 0  ;;  %s3041_s24 = smov 0   ;;  %s3043_s25 = smov 0  }
   0x2   :  { %s3045_s26 = smov 0   ;;  %s3047_s27 = smov 0  }
   0x3   :  { %s3049_s28 = smov 0   ;;  %s3051_s29 = smov 0  }
   0x4   :  { %s3053_s30 = smov 0   ;;  %s3055_s8 = smov 0  }
   0x5 LB: > { %s2239_s9 = sadd.s32 4294967295, %s2995_s8   ;;  %s2240_s10 = sadd.s32 4294967294, %s2995_s8   ;;  %s2995_s8 = sphi %s3055_s8, %s20_s8   ;;  %s2991_s30 = sphi %s3053_s30, %s3805_s30   ;;  %s2987_s29 = sphi %s3051_s29, %s3804_s29   ;;  %s2983_s28 = sphi %s3049_s28, %s3803_s28   ;;  %s2979_s27 = sphi %s3047_s27, %s3802_s27   ;;  %s2975_s26 = sphi %s3045_s26, %s3801_s26   ;;  %s2971_s25 = sphi %s3043_s25, %s3800_s25   ;;  %s2967_s24 = sphi %s3041_s24, %s3799_s24  }
   0x6   : > { %s29_s11 = sadd.s32 1, %s2987_s29  ;;  %s32_s12 = sadd.s32 1, %s2991_s30 }
   0x7   : > { %p30_p0 = scmp.ge.s32.totalorder %s29_s11, 2  ;;  %p203_p1 = scmp.ne.s32.totalorder %s2975_s26, %s2971_s25 }
   0x8   : > { %p204_p2 = scmp.eq.s32.totalorder %s2239_s9, 3  ;;  %p209_p4 = scmp.ne.s32.totalorder %s2971_s25, %s2967_s24 }
   0x9   : > { %s3807_s11 = smov (%p30_p0, %s29_s11), 0  ;;  %s3809_s12 = smov (!%p30_p0, %s32_s12), %s2991_s30 }
   0xa   : > { %3789 = sst [smem:[#allocation6_spill]] %s3807_s11  ;;  %p3090_p3 = por %p204_p2, %p203_p1 }
   0xb   : > { %p34_p5 = scmp.ge.s32.totalorder %s3809_s12, 2  ;;  %p210_p6 = scmp.eq.s32.totalorder %s2240_s10, 3 }
   0xc   : > { %p2243_p7 = scmp.ge.s32.totalorder %s2995_s8, 1  ;;  %p258_p8 = scmp.lt.s32.totalorder %s2995_s8, 5 }
   0xd   : > { %s3811_s12 = smov (%p34_p5, %s3809_s12), 0  ;;  %p3100_p9 = por %p210_p6, %p209_p4 }
   0xe   : > { %3791 = sst [smem:[#allocation7_spill]] %s3811_s12  ;;  %p259_p10 = pnand %p2243_p7, %p258_p8 }
   0xf   : > { %s190_s15 = ssub.s32 %s2991_s30, %s3811_s12  ;;  %s193_s16 = sadd.s32 1, %s2975_s26 }
  0x10   : > { %p191_p11 = scmp.eq.s32.totalorder %s190_s15, 0  ;;  %262 = sbr.rel (%p259_p10) target bundleno = 905 (0x389), region = 48 }
  0x11   : > { %s291_s18 = sand.u32 (!%p259_p10), 1, %s2971_s25   ;;  %p293_p12 = scmp.lt.s32.totalorder (!%p259_p10), %s2983_s28, 1 }
  0x12   : > { %s3108_s17 = scalar_select %p191_p11, %s2975_s26, %s193_s16  }
  0x13   : > { %p295_p13 = scmp.lt.s32.totalorder (!%p259_p10), %s2979_s27, 1  ;;  %s3122_s12 = scalar_lea.vmem (!%p259_p10), [#allocation3], %s291_s18 }
  0x14   : > { %p2245_p0 = scmp.ne.s32.totalorder (!%p259_p10), %s2979_s27, 0 }
  0x17   : > { %s294_s19 = scalar_select %p293_p12, %s2983_s28, 1 }
  0x18   : > { %s296_s20 = scalar_select %p295_p13, %s2979_s27, 1 }
  0x19   : > { %s2806_s21 = smul.u32 60, %s294_s19  ;;  %vm307_vm0 = vcmask (!%p2245_p0), 253952   ;;  %v2997_v0 = vmov (!%p2245_p0), 0.0  }
  0x1a   : > { %s2805_s22 = smul.u32 30, %s296_s20  ;;  %308 = vst.msk [vmem:[#allocation2] sm:$0x1] (!%p2245_p0), %vm307_vm0, %v2997_v0 }
  0x1b   : > { %306 = sbr.rel (%p2245_p0) target bundleno = 34 (0x22), region = 52 }
  0x1c   : > { %s299_s23 = sadd.s32 %s2806_s21, %s2805_s22 }
  0x1d   : > { %s2244_s9 = sshll.u32 %s299_s23, 2 }
  0x1e   : > { %s3118_s16 = scalar_lea.vmem %s3780_s0, %s2244_s9 }
  0x22 PF: > { %v2246_v1 = vld [vmem:[%s3781_s1 + $0x2] sm:$0x3]  ;;  %vm586_vm1 = vcmask 1041408   ;;  %v3131_v2 = vld [vmem:[%s3781_s1 + $0x8] sm:$0x3]  ;;  %vm561_vm5 = vcmask 31744  }
  0x23   : > { %2795 = vmatprep.subr.msk.bf16.mxu1 %vm586_vm1, %v2246_v1  ;;  %2799 = vmatprep.subr.msk.bf16.mxu0 %vm586_vm1, %v3131_v2  ;;  %v588_v3 = vsel %vm586_vm1, %v2246_v1, 0  ;;  %v3139_v4 = vsel %vm586_vm1, %v3131_v2, 0  ;;  %v3142_v5 = vld [vmem:[%s3118_s16] sm:$0xf]  ;;  %v3145_v6 = vld [vmem:[%s3118_s16 + $0x4] sm:$0xf] }
  0x24   : > { %2476 = vmatpush3.bf16.msra.mxu1 %v588_v3  ;;  %2548 = vmatpush3.bf16.msra.mxu0 %v3139_v4  ;;  %v3149_v7 = vld [vmem:[%s3118_s16 + $0x8] sm:$0x1]  ;;  %vm340_vm2 = vsmask.f32 3328  ;;  %vm341_vm3 = vsmask.f32 7440 }
  0x25   : > { %v344_v8 = vshrl.u32 %v3142_v5, 16  ;;  %v347_v9 = vshll.u32 %v3142_v5, 16  ;;  %v353_v10 = vshll.u32 %v3145_v6, 16  ;;  %v357_v11 = vshrl.u32 %v3145_v6, 16  ;;  %v339_v12 = vld [vmem:[%s3781_s1] sm:$0x3]  ;;  %vm3183_vm4 = vmor %vm340_vm2, %vm341_vm3 }
  0x26   : > { %v363_v13 = vshll.u32 %v3149_v7, 16  ;;  %2796 = vmatprep.subr.msk.bf16.mxu1 %vm586_vm1, %v339_v12  ;;  %v3161_v14 = vld [vmem:[%s3118_s16 + $0xc] sm:$0xf]  ;;  %v3164_v15 = vld [vmem:[%s3118_s16 + $0x10] sm:$0xf]  ;;  %v752_v42 = vsel %vm586_vm1, %v339_v12, 0 }
  0x27   : > { %v346_v16 = vrot.slane %v344_v8, 4  ;;  %v349_v17 = vrot.slane %v347_v9, 5  ;;  %v355_v18 = vrot.slane %v353_v10, 5  ;;  %v359_v19 = vrot.slane %v357_v11, 4  ;;  %v3167_v20 = vld [vmem:[%s3118_s16 + $0x14] sm:$0x1] }
  0x28   : > { %v365_v21 = vrot.slane %v363_v13, 5  ;;  %v368_v22 = vshrl.u32 %v3161_v14, 16  ;;  %v371_v23 = vshll.u32 %v3161_v14, 16  ;;  %v377_v24 = vshll.u32 %v3164_v15, 16  ;;  %v2325_v25 = vld [vmem:[%s3781_s1 + $0xa] sm:$0x3] }
  0x29   : > { %v350_v26 = vor.u32 %v349_v17, %v346_v16  ;;  %v360_v27 = vor.u32 %v359_v19, %v355_v18  ;;  %v381_v28 = vshrl.u32 %v3164_v15, 16  ;;  %v387_v29 = vshll.u32 %v3167_v20, 16  ;;  %2801 = vmatprep.subr.msk.bf16.mxu0 %vm586_vm1, %v2325_v25  ;;  %v3179_v30 = vld [vmem:[%s3118_s16 + $0x18] sm:$0xf]  ;;  %v3188_v39 = vld [vmem:[%s3118_s16 + $0x1c] sm:$0xf] }
  0x2a   : > { %v370_v32 = vrot.slane %v368_v22, 4  ;;  %v373_v33 = vrot.slane %v371_v23, 5  ;;  %v379_v34 = vrot.slane %v377_v24, 5  ;;  %v874_v41 = vrot.slane %v3167_v20, 5  ;;  %v3193_v43 = vld [vmem:[%s3118_s16 + $0x20] sm:$0x1] }
  0x2b   : > { %v351_v35 = vrot.slane %v350_v26, 4  ;;  %v361_v36 = vrot.slane %v360_v27, 4  ;;  %v383_v37 = vrot.slane %v381_v28, 4  ;;  %v389_v38 = vrot.slane %v387_v29, 5  ;;  %v3205_v57 = vld [vmem:[%s3118_s16 + $0x24] sm:$0xf] }
  0x2c   : > { %v374_v40 = vor.u32 %v373_v33, %v370_v32  ;;  %v392_v44 = vshrl.u32 %v3179_v30, 16  ;;  %v395_v48 = vshll.u32 %v3179_v30, 16  ;;  %v401_v52 = vshll.u32 %v3188_v39, 16  ;;  %v3213_v62 = vld [vmem:[%s3118_s16 + $0x28] sm:$0xf]  ;;  %p2367_p1 = scmp.ne.s32.totalorder %s2979_s27, 1 }
  0x2d   : > { %v356_v45 = vsel %vm3183_vm4, %v351_v35, %v355_v18  ;;  %v366_v46 = vsel %vm3183_vm4, %v361_v36, %v365_v21  ;;  %v384_v47 = vor.u32 %v383_v37, %v379_v34  ;;  %v405_v55 = vshrl.u32 %v3188_v39, 16  ;;  %v3218_v8 = vld [vmem:[%s3118_s16 + $0x2c] sm:$0x1]  ;;  %v3221_v9 = vld [vmem:[%s3118_s16 + $0x30] sm:$0xf] }
  0x2e   : > { %v2247_v49 = vcombine.low %v356_v45, %v366_v46  ;;  %v375_v50 = vrot.slane %v374_v40, 4  ;;  %v394_v51 = vrot.slane %v392_v44, 4  ;;  %v397_v54 = vrot.slane %v395_v48, 5  ;;  %v3232_v24 = vld [vmem:[%s3118_s16 + $0x34] sm:$0xf] }
  0x2f   : > { %v385_v53 = vrot.slane %v384_v47, 4  ;;  %v411_v56 = vshll.u32 %v3193_v43, 16  ;;  %v403_v59 = vrot.slane %v401_v52, 5  ;;  %v878_v60 = vrot.slane %v3188_v39, 5  ;;  %v3238_v32 = vld [vmem:[%s3118_s16 + $0x38] sm:$0x1] }
  0x30   : > { %2477 = vmatprep.mubr.msk.bf16.mxu1 %vm561_vm5, %v2247_v49  ;;  %v380_v58 = vsel %vm3183_vm4, %v375_v50, %v379_v34  ;;  %v881_v61 = vrot.slane %v3193_v43, 5  ;;  %v398_v0 = vor.u32 %v397_v54, %v394_v51  ;;  %v407_v1 = vrot.slane %v405_v55, 4  ;;  %v2335_v44 = vld [vmem:[%s3781_s1 + $0xc] sm:$0x3]  ;;  %v3254_v49 = vld [vmem:[%s3781_s1 + $0x4] sm:$0x3] }
  0x31   : > { %v390_v63 = vsel %vm3183_vm4, %v385_v53, %v389_v38  ;;  %v413_v3 = vrot.slane %v411_v56, 5  ;;  %v1375_v11 = vsel %vm586_vm1, %v2325_v25, 0  ;;  %v416_v12 = vshrl.u32 %v3205_v57, 16  ;;  %v3257_v53 = vld [vmem:[%s3118_s16 + $0x3c] sm:$0xf] }
  0x32   : > { %v2248_v10 = vcombine.low %v380_v58, %v390_v63  ;;  %v419_v13 = vshll.u32 %v3205_v57, 16  ;;  %v399_v16 = vrot.slane %v398_v0, 4  ;;  %v408_v17 = vor.u32 %v407_v1, %v403_v59  ;;  %v3268_v58 = vld [vmem:[%s3118_s16 + $0x40] sm:$0xf] }
  0x33   : > { %v425_v18 = vshll.u32 %v3213_v62, 16  ;;  %v429_v19 = vshrl.u32 %v3213_v62, 16  ;;  %v418_v21 = vrot.slane %v416_v12, 4  ;;  %v435_v23 = vshll.u32 %v3218_v8, 16  ;;  %v3653_v0 = vld [vmem:[%s3782_s2] ss:$0 sm:$0xff] }
  0x34   : > { %2549 = vmatprep.mubr.msk.bf16.mxu0 %vm561_vm5, %v2248_v10  ;;  %2478 = vmatmul.mubr.msk.bf16.vlgmr.msra.gmra.mrb[0].mxu1 %vm561_vm5, %v2248_v10  ;;  %v421_v22 = vrot.slane %v419_v13, 5  ;;  %v440_v25 = vshrl.u32 %v3221_v9, 16  ;;  %v404_v26 = vsel %vm3183_vm4, %v399_v16, %v403_v59  ;;  %v409_v27 = vrot.slane %v408_v17, 4  ;;  %v3282_v13 = vld [vmem:[%s3118_s16 + $0x44] sm:$0x1] }
  0x35   : > { %2494 = vmatpush3.bf16.msra.mxu1 %v752_v42  ;;  %v427_v28 = vrot.slane %v425_v18, 5  ;;  %v431_v29 = vrot.slane %v429_v19, 4  ;;  %v437_v34 = vrot.slane %v435_v23, 5  ;;  %v443_v36 = vshll.u32 %v3221_v9, 16 }
  0x36   : > { %v422_v33 = vor.u32 %v421_v22, %v418_v21  ;;  %v442_v35 = vrot.slane %v440_v25, 4  ;;  %v414_v37 = vsel %vm3183_vm4, %v409_v27, %v413_v3  ;;  %v449_v40 = vshll.u32 %v3232_v24, 16  ;;  %2797 = vmatprep.subr.msk.bf16.mxu1 %vm586_vm1, %v3254_v49 }
  0x37   : > { %v432_v38 = vor.u32 %v431_v29, %v427_v28  ;;  %v453_v42 = vshrl.u32 %v3232_v24, 16  ;;  %v3248_v45 = vcombine.low %v404_v26, %v414_v37  ;;  %v445_v47 = vrot.slane %v443_v36, 5 }
  0x38   : > { %v423_v46 = vrot.slane %v422_v33, 4  ;;  %v459_v48 = vshll.u32 %v3238_v32, 16  ;;  %v451_v51 = vrot.slane %v449_v40, 5  ;;  %vm859_vm6 = vcmask 1042432   ;;  %v3311_v40 = vld [vmem:[%s3118_s16 + $0x4c] sm:$0xf] }
  0x39   : > { %v433_v50 = vrot.slane %v432_v38, 4  ;;  %v455_v52 = vrot.slane %v453_v42, 4  ;;  %2550 = vmatmul.mubr.msk.bf16.vlgmr.msra.gmra.mrb[0].mxu0 %vm561_vm5, %v3248_v45  ;;  %2481 = vmatprep.mubr.msk.bf16.mxu1 %vm561_vm5, %v3248_v45  ;;  %v446_v55 = vor.u32 %v445_v47, %v442_v35  ;;  %vm860_vm7 = vcmask 1046532  }
  0x3a   : > { %v428_v54 = vsel %vm3183_vm4, %v423_v46, %v427_v28  ;;  %v461_v56 = vrot.slane %v459_v48, 5  ;;  %2566 = vmatpush3.bf16.msra.mxu0 %v1375_v11  ;;  %vm3272_vm8 = vmor %vm859_vm6, %vm860_vm7  ;;  %v2280_v1 = vrot.slane %v3161_v14, 9  ;;  %v871_v3 = vrot.slane %v3164_v15, 5 }
  0x3b   : > { %v438_v59 = vsel %vm3183_vm4, %v433_v50, %v437_v34  ;;  %v456_v63 = vor.u32 %v455_v52, %v451_v51  ;;  %v447_v12 = vrot.slane %v446_v55, 4  ;;  %2802 = vmatprep.subr.msk.bf16.mxu0 %vm586_vm1, %v2335_v44  ;;  %v464_v11 = vshrl.u32 %v3257_v53, 16  ;;  %v3304_v34 = vld [vmem:[%s3118_s16 + $0x48] sm:$0xf]  ;;  %v3322_v50 = vld [vmem:[%s3118_s16 + $0x50] sm:$0x1] }
  0x3c   : > { %v3278_v10 = vcombine.low %v428_v54, %v438_v59  ;;  %v467_v16 = vshll.u32 %v3257_v53, 16  ;;  %v872_v18 = vsel %vm3272_vm8, %v2280_v1, %v871_v3  ;;  %v873_v19 = vrot.slane %v871_v3, 4 }
  0x3d   : > { %v457_v17 = vrot.slane %v456_v63, 4  ;;  %v473_v21 = vshll.u32 %v3268_v58, 16  ;;  %v452_v22 = vsel %vm3183_vm4, %v447_v12, %v451_v51  ;;  %v466_v23 = vrot.slane %v464_v11, 4 }
  0x3e   : > { %2553 = vmatprep.mubr.msk.bf16.mxu0 %vm561_vm5, %v3278_v10  ;;  %2482 = vmatmul.mubr.msk.bf16.gmra.mrb[4].mxu1 %vm561_vm5, %v3278_v10  ;;  %v469_v25 = vrot.slane %v467_v16, 5  ;;  %v477_v26 = vshrl.u32 %v3268_v58, 16  ;;  %v875_v28 = vsel %vm3272_vm8, %v873_v19, %v874_v41  ;;  %v483_v33 = vshll.u32 %v3282_v13, 16  ;;  %v3344_v16 = vld [vmem:[%s3118_s16 + $0x54] sm:$0xf] }
  0x3f   : > { %v462_v27 = vsel %vm3183_vm4, %v457_v17, %v461_v56  ;;  %v475_v29 = vrot.slane %v473_v21, 5  ;;  %v3308_v36 = vcombine.low %v872_v18, %v875_v28  ;;  %v2281_v20 = vrot.slane %v3179_v30, 9  ;;  %v3352_v21 = vld [vmem:[%s3118_s16 + $0x58] sm:$0xf] }
  0x40   : > { %v3306_v35 = vcombine.low %v452_v22, %v462_v27  ;;  %v470_v37 = vor.u32 %v469_v25, %v466_v23  ;;  %v479_v38 = vrot.slane %v477_v26, 4  ;;  %v485_v42 = vrot.slane %v483_v33, 5  ;;  %v3357_v27 = vld [vmem:[%s3118_s16 + $0x5c] sm:$0x1] }
  0x41   : > { %v880_v41 = vrot.slane %v878_v60, 4  ;;  %v1501_v46 = vsel %vm586_vm1, %v2335_v44, 0  ;;  %v488_v51 = vshrl.u32 %v3304_v34, 16  ;;  %v491_v52 = vshll.u32 %v3304_v34, 16 }
  0x42   : > { %2554 = vmatmul.mubr.msk.bf16.gmra.mrb[4].mxu0 %vm561_vm5, %v3306_v35  ;;  %2485 = vmatprep.mubr.msk.bf16.mxu1 %vm561_vm5, %v3306_v35  ;;  %v471_v47 = vrot.slane %v470_v37, 4  ;;  %v480_v48 = vor.u32 %v479_v38, %v475_v29  ;;  %v879_v44 = vsel %vm3272_vm8, %v2281_v20, %v878_v60  ;;  %v497_v55 = vshll.u32 %v3311_v40, 16 }
  0x43   : > { %2567 = vmatprep.mubr.msk.bf16.mxu0 %vm561_vm5, %v3308_v36  ;;  %v882_v54 = vsel %vm3272_vm8, %v880_v41, %v881_v61  ;;  %v501_v56 = vshrl.u32 %v3311_v40, 16  ;;  %v490_v3 = vrot.slane %v488_v51, 4  ;;  %v493_v12 = vrot.slane %v491_v52, 5  ;;  %v3370_v41 = vld [vmem:[%s3781_s1 + $0xe] sm:$0x3] }
  0x44   : > { %v476_v59 = vsel %vm3183_vm4, %v471_v47, %v475_v29  ;;  %v481_v63 = vrot.slane %v480_v48, 4  ;;  %v3340_v1 = vcombine.low %v879_v44, %v882_v54  ;;  %v499_v60 = vrot.slane %v497_v55, 5 }
  0x45   : > { %v503_v11 = vrot.slane %v501_v56, 4  ;;  %v507_v43 = vshll.u32 %v3322_v50, 16  ;;  %v2282_v17 = vrot.slane %v3205_v57, 9  ;;  %v885_v18 = vrot.slane %v3213_v62, 5 }
  0x46   : > { %v486_v61 = vsel %vm3183_vm4, %v481_v63, %v485_v42  ;;  %v888_v19 = vrot.slane %v3218_v8, 5  ;;  %v494_v23 = vor.u32 %v493_v12, %v490_v3  ;;  %v512_v33 = vshrl.u32 %v3344_v16, 16 }
  0x47   : > { %v3354_v22 = vcombine.low %v476_v59, %v486_v61  ;;  %v504_v25 = vor.u32 %v503_v11, %v499_v60  ;;  %v509_v26 = vrot.slane %v507_v43, 5  ;;  %v886_v28 = vsel %vm3272_vm8, %v2282_v17, %v885_v18 }
  0x48   : > { %v887_v29 = vrot.slane %v885_v18, 4  ;;  %v515_v37 = vshll.u32 %v3344_v16, 16  ;;  %v495_v8 = vrot.slane %v494_v23, 4  ;;  %v521_v42 = vshll.u32 %v3352_v21, 16 }
  0x49   : > { %2486 = vmatmul.mubr.msk.bf16.gmra.mrb[8].mxu1 %vm561_vm5, %v3354_v22  ;;  %v505_v38 = vrot.slane %v504_v25, 4  ;;  %v525_v20 = vshrl.u32 %v3352_v21, 16  ;;  %v514_v48 = vrot.slane %v512_v33, 4  ;;  %v531_v52 = vshll.u32 %v3357_v27, 16 }
  0x4a   : > { %2568 = vmatmul.mubr.msk.bf16.vlgmr.msra.gmra.mrb[0].mxu0 %vm561_vm5, %v3340_v1  ;;  %v889_v47 = vsel %vm3272_vm8, %v887_v29, %v888_v19  ;;  %v517_v51 = vrot.slane %v515_v37, 5  ;;  %v500_v44 = vsel %vm3183_vm4, %v495_v8, %v499_v60  ;;  %v523_v56 = vrot.slane %v521_v42, 5 }
  0x4b   : > { %2584 = vmatpush3.bf16.msra.mxu0 %v1501_v46  ;;  %v510_v54 = vsel %vm3183_vm4, %v505_v38, %v509_v26  ;;  %v3381_v55 = vcombine.low %v886_v28, %v889_v47  ;;  %v527_v3 = vrot.slane %v525_v20, 4  ;;  %v533_v12 = vrot.slane %v531_v52, 5 }
  0x4c   : > { %v3383_v59 = vcombine.low %v500_v44, %v510_v54  ;;  %v518_v63 = vor.u32 %v517_v51, %v514_v48  ;;  %2803 = vmatprep.subr.msk.bf16.mxu0 %vm586_vm1, %v3370_v41  ;;  %v2283_v46 = vrot.slane %v3221_v9, 9  ;;  %v892_v60 = vrot.slane %v3232_v24, 5  ;;  %v3418_v51 = vld [vmem:[%s3118_s16 + $0x64] sm:$0xf] }
  0x4d   : > { %2571 = vmatprep.mubr.msk.bf16.mxu0 %vm561_vm5, %v3381_v55  ;;  %v895_v11 = vrot.slane %v3238_v32, 5  ;;  %v2284_v43 = vrot.slane %v3257_v53, 9  ;;  %v528_v17 = vor.u32 %v527_v3, %v523_v56  ;;  %v899_v18 = vrot.slane %v3268_v58, 5 }
  0x4e   : > { %2489 = vmatprep.mubr.msk.bf16.mxu1 %vm561_vm5, %v3383_v59  ;;  %v519_v61 = vrot.slane %v518_v63, 4  ;;  %v902_v19 = vrot.slane %v3282_v13, 5  ;;  %v893_v23 = vsel %vm3272_vm8, %v2283_v46, %v892_v60  ;;  %v894_v25 = vrot.slane %v892_v60, 4  ;;  %v3441_v60 = vld [vmem:[%s3118_s16 + $0x60] sm:$0xf] }
  0x4f   : > { %v2263_v26 = vcombine.low %v3142_v5, %v3145_v6  ;;  %v529_v28 = vrot.slane %v528_v17, 4  ;;  %v900_v29 = vsel %vm3272_vm8, %v2284_v43, %v899_v18  ;;  %v901_v33 = vrot.slane %v899_v18, 4 }
  0x50   : > { %v524_v32 = vsel %vm3183_vm4, %v519_v61, %v523_v56  ;;  %v896_v37 = vsel %vm3272_vm8, %v894_v25, %v895_v11  ;;  %v2285_v13 = vrot.slane %v3304_v34, 9  ;;  %v906_v8 = vrot.slane %v3311_v40, 5  ;;  %v3444_v11 = vld [vmem:[%s3118_s16 + $0x68] sm:$0x1] }
  0x51   : > { %v909_v38 = vrot.slane %v3322_v50, 5  ;;  %v534_v42 = vsel %vm3183_vm4, %v529_v28, %v533_v12  ;;  %v3412_v20 = vcombine.low %v893_v23, %v896_v37  ;;  %v903_v47 = vsel %vm3272_vm8, %v901_v33, %v902_v19 }
  0x52   : > { %v2286_v48 = vrot.slane %v3344_v16, 9  ;;  %v3420_v52 = vcombine.low %v524_v32, %v534_v42  ;;  %v3422_v44 = vcombine.low %v900_v29, %v903_v47  ;;  %v908_v54 = vrot.slane %v906_v8, 4  ;;  %v2304_v29 = vld [vmem:[%s3781_s1 + $0x6] sm:$0x3] }
  0x53   : > { %2572 = vmatmul.mubr.msk.bf16.gmra.mrb[4].mxu0 %vm561_vm5, %v3412_v20  ;;  %v913_v50 = vrot.slane %v3352_v21, 5  ;;  %v916_v56 = vrot.slane %v3357_v27, 5  ;;  %v907_v63 = vsel %vm3272_vm8, %v2285_v13, %v906_v8  ;;  %v1361_v12 = vrot.slane %v3418_v51, 5 }
  0x54   : > { %2490 = vmatmul.mubr.msk.bf16.gmra.mrb[12].mxu1 %vm561_vm5, %v3420_v52  ;;  %2575 = vmatprep.mubr.msk.bf16.mxu0 %vm561_vm5, %v3422_v44  ;;  %v910_v3 = vsel %vm3272_vm8, %v908_v54, %v909_v38  ;;  %v867_v43 = vrot.slane %v3149_v7, 5  ;;  %v3449_v61 = vcombine.low %v3161_v14, %v3164_v15  ;;  %v2279_v19 = vrot.slane %v3142_v5, 9 }
  0x55   : > { %2495 = vmatprep.mubr.msk.bf16.mxu1 %vm561_vm5, %v2263_v26  ;;  %v914_v46 = vsel %vm3272_vm8, %v2286_v48, %v913_v50  ;;  %v915_v27 = vrot.slane %v913_v50, 4  ;;  %v3451_v17 = vcombine.low %v907_v63, %v910_v3  ;;  %v864_v23 = vrot.slane %v3145_v6, 5 }
  0x56   : > { %v2324_v26 = vrot.slane %v3441_v60, 9  ;;  %v1363_v32 = vrot.slane %v1361_v12, 4  ;;  %v1364_v7 = vrot.slane %v3444_v11, 5  ;;  %v3463_v14 = vcombine.low %v3179_v30, %v3188_v39 }
  0x57   : > { %v917_v18 = vsel %vm3272_vm8, %v915_v27, %v916_v56  ;;  %v865_v15 = vsel %vm3272_vm8, %v2279_v19, %v864_v23  ;;  %v866_v28 = vrot.slane %v864_v23, 4  ;;  %v969_v5 = vsel %vm586_vm1, %v3254_v49, 0  ;;  %v338_v23 = vld [vmem:[%s3118_s16 + $0x74] sm:$0x1] }
  0x58   : > { %v3457_v25 = vcombine.low %v914_v46, %v917_v18  ;;  %v1362_v30 = vsel %vm3272_vm8, %v2324_v26, %v1361_v12  ;;  %v1365_v39 = vsel %vm3272_vm8, %v1363_v32, %v1364_v7  ;;  %v3491_v37 = vcombine.low %v3205_v57, %v3213_v62 }
  0x59   : > { %v868_v6 = vsel %vm3272_vm8, %v866_v28, %v867_v43  ;;  %v3487_v33 = vcombine.low %v1362_v30, %v1365_v39  ;;  %v3495_v13 = vcombine.low %v3221_v9, %v3232_v24  ;;  %v3507_v57 = vcombine.low %v3257_v53, %v3268_v58  ;;  %v2356_v24 = vld [vmem:[%s3781_s1 + $0x10] sm:$0x3] }
  0x5a   : > { %v2288_v49 = vcombine.low %v865_v15, %v868_v6  ;;  %v1649_v62 = vsel %vm586_vm1, %v3370_v41, 0  ;;  %v3513_v9 = vcombine.low %v3304_v34, %v3311_v40  ;;  %v3529_v53 = vcombine.low %v3344_v16, %v3352_v21  ;;  %v3550_v40 = vld [vmem:[%s3118_s16 + $0x6c] sm:$0xf]  ;;  %v3553_v16 = vld [vmem:[%s3118_s16 + $0x70] sm:$0xf] }
  0x5b   : > { %2576 = vmatmul.mubr.msk.bf16.gmra.mrb[8].mxu0 %vm561_vm5, %v3451_v17  ;;  %v3540_v58 = vcombine.low %v3441_v60, %v3418_v51  ;;  %v1095_v34 = vsel %vm586_vm1, %v2304_v29, 0  ;;  %v2336_v21 = vcombine.low %v3550_v40, %v3553_v16  ;;  %v1214_v41 = vshll.u32 %v3441_v60, 16 }
  0x5c   : > { %2496 = vmatmul.mubr.msk.bf16.vlgmr.msra.gmra.mrb[0].mxu1 %vm561_vm5, %v3449_v61  ;;  %2579 = vmatprep.mubr.msk.bf16.mxu0 %vm561_vm5, %v3457_v25  ;;  %v1224_v8 = vshrl.u32 %v3418_v51, 16  ;;  %v1781_v38 = vsel %vm586_vm1, %v2356_v24, 0  ;;  %v1620_v50 = vshll.u32 %v3550_v40, 16  ;;  %v1630_v56 = vshrl.u32 %v3553_v16, 16 }
  0x5d   : > { %2512 = vmatpush3.bf16.msra.mxu1 %v969_v5  ;;  %2499 = vmatprep.mubr.msk.bf16.mxu1 %vm561_vm5, %v3463_v14  ;;  %v1216_v47 = vrot.slane %v1214_v41, 5  ;;  %v1230_v3 = vshll.u32 %v3444_v11, 16  ;;  %v1636_v11 = vshll.u32 %v338_v23, 16  ;;  %v2355_v31 = vrot.slane %v3550_v40, 9 }
  0x5e   : > { %2798 = vmatprep.subr.msk.bf16.mxu1 %vm586_vm1, %v2304_v29  ;;  %v1226_v54 = vrot.slane %v1224_v8, 4  ;;  %v1622_v46 = vrot.slane %v1620_v50, 5  ;;  %vm1936_vm9 = vcmask 261120   ;;  %vm1975_vm10 = vcmask 253952  }
  0x5f   : > { %v1232_v19 = vrot.slane %v1230_v3, 5  ;;  %v1638_v6 = vrot.slane %v1636_v11, 5  ;;  %vm2999_vm11 = vmmov (!%p2367_p1), 0  }
  0x63   : > { %2580 = vmatmul.mubr.msk.bf16.gmra.mrb[12].mxu0 %vm561_vm5, %v3487_v33 }
  0x64   : > { %2500 = vmatmul.mubr.msk.bf16.gmra.mrb[4].mxu1 %vm561_vm5, %v3491_v37  ;;  %2585 = vmatprep.mubr.msk.bf16.mxu0 %vm561_vm5, %v3463_v14 }
  0x65   : > { %2503 = vmatprep.mubr.msk.bf16.mxu1 %vm561_vm5, %v3495_v13 }
  0x6b   : > { %2586 = vmatmul.mubr.msk.bf16.vlgmr.msra.gmra.mrb[0].mxu0 %vm561_vm5, %v3491_v37 }
  0x6c   : > { %2504 = vmatmul.mubr.msk.bf16.gmra.mrb[8].mxu1 %vm561_vm5, %v3507_v57  ;;  %2602 = vmatpush3.bf16.msra.mxu0 %v1649_v62 }
  0x6d   : > { %2507 = vmatprep.mubr.msk.bf16.mxu1 %vm561_vm5, %v3513_v9  ;;  %2589 = vmatprep.mubr.msk.bf16.mxu0 %vm561_vm5, %v3495_v13 }
  0x6e   : > { %2804 = vmatprep.subr.msk.bf16.mxu0 %vm586_vm1, %v2356_v24 }
  0x73   : > { %2590 = vmatmul.mubr.msk.bf16.gmra.mrb[4].mxu0 %vm561_vm5, %v3507_v57 }
  0x74   : > { %2508 = vmatmul.mubr.msk.bf16.gmra.mrb[12].mxu1 %vm561_vm5, %v3529_v53  ;;  %2593 = vmatprep.mubr.msk.bf16.mxu0 %vm561_vm5, %v3513_v9 }
  0x75   : > { %2513 = vmatprep.mubr.msk.bf16.mxu1 %vm561_vm5, %v2288_v49 }
  0x7b   : > { %2594 = vmatmul.mubr.msk.bf16.gmra.mrb[8].mxu0 %vm561_vm5, %v3529_v53 }
  0x7c   : > { %2514 = vmatmul.mubr.msk.bf16.vlgmr.msra.gmra.mrb[0].mxu1 %vm561_vm5, %v3308_v36  ;;  %2597 = vmatprep.mubr.msk.bf16.mxu0 %vm561_vm5, %v3540_v58  ;;  %v1211_v36 = vshrl.u32 %v3441_v60, 16  ;;  %v1632_v60 = vrot.slane %v1630_v56, 4 }
  0x7d   : > { %2530 = vmatpush3.bf16.msra.mxu1 %v1095_v34  ;;  %2517 = vmatprep.mubr.msk.bf16.mxu1 %vm561_vm5, %v3340_v1 }
  0x7e   : > { %2800 = vmatprep.subr.msk.bf16.mxu1 %vm586_vm1, %v3131_v2  ;;  %v1220_v2 = vshll.u32 %v3418_v51, 16  ;;  %v1213_v42 = vrot.slane %v1211_v36, 4  ;;  %v1626_v51 = vshll.u32 %v3553_v16, 16 }
  0x80   : > { %v1222_v48 = vrot.slane %v1220_v2, 5  ;;  %v1628_v27 = vrot.slane %v1626_v51, 5 }
  0x82   : > { %v1227_v63 = vor.u32 %v1226_v54, %v1222_v48  ;;  %v1633_v26 = vor.u32 %v1632_v60, %v1628_v27 }
  0x83   : > { %2598 = vmatmul.mubr.msk.bf16.gmra.mrb[12].mxu0 %vm561_vm5, %v2336_v21 }
  0x84   : > { %2518 = vmatmul.mubr.msk.bf16.gmra.mrb[4].mxu1 %vm561_vm5, %v3381_v55  ;;  %2603 = vmatprep.mubr.msk.bf16.mxu0 %vm561_vm5, %v3248_v45  ;;  %v1617_v45 = vshrl.u32 %v3550_v40, 16  ;;  %v1228_v18 = vrot.slane %v1227_v63, 4  ;;  %v1634_v5 = vrot.slane %v1633_v26, 4 }
  0x85   : > { %2521 = vmatprep.mubr.msk.bf16.mxu1 %vm561_vm5, %v3412_v20 }
  0x86   : > { %v1619_v12 = vrot.slane %v1617_v45, 4  ;;  %v1233_v7 = vsel %vm3183_vm4, %v1228_v18, %v1232_v19  ;;  %v1639_v29 = vsel %vm3183_vm4, %v1634_v5, %v1638_v6 }
  0x8b   : > { %2604 = vmatmul.mubr.msk.bf16.vlgmr.msra.gmra.mrb[0].mxu0 %vm561_vm5, %v3278_v10  ;;  %v1217_v10 = vor.u32 %v1216_v47, %v1213_v42 }
  0x8c   : > { %2522 = vmatmul.mubr.msk.bf16.gmra.mrb[8].mxu1 %vm561_vm5, %v3422_v44  ;;  %2620 = vmatpush3.bf16.msra.mxu0 %v1781_v38 }
  0x8d   : > { %2525 = vmatprep.mubr.msk.bf16.mxu1 %vm561_vm5, %v3451_v17  ;;  %2607 = vmatprep.mubr.msk.bf16.mxu0 %vm561_vm5, %v3306_v35  ;;  %v1218_v43 = vrot.slane %v1217_v10, 4  ;;  %v1623_v35 = vor.u32 %v1622_v46, %v1619_v12 }
  0x8f   : > { %v1223_v32 = vsel %vm3183_vm4, %v1218_v43, %v1222_v48  ;;  %v1624_v28 = vrot.slane %v1623_v35, 4 }
  0x90   : > { %v2315_v15 = vcombine.low %v1223_v32, %v1233_v7 }
  0x93   : > { %2608 = vmatmul.mubr.msk.bf16.gmra.mrb[4].mxu0 %vm561_vm5, %v3354_v22 }
  0x94   : > { %2526 = vmatmul.mubr.msk.bf16.gmra.mrb[12].mxu1 %vm561_vm5, %v3457_v25  ;;  %2611 = vmatprep.mubr.msk.bf16.mxu0 %vm561_vm5, %v3383_v59 }
  0x95   : > { %2531 = vmatprep.mubr.msk.bf16.mxu1 %vm561_vm5, %v3449_v61  ;;  %v1629_v61 = vsel %vm3183_vm4, %v1624_v28, %v1628_v27 }
  0x96   : > { %v2346_v30 = vcombine.low %v1629_v61, %v1639_v29 }
  0x9b   : > { %2612 = vmatmul.mubr.msk.bf16.gmra.mrb[8].mxu0 %vm561_vm5, %v3420_v52 }
  0x9c   : > { %2532 = vmatmul.mubr.msk.bf16.vlgmr.msra.gmra.mrb[0].mxu1 %vm561_vm5, %v3463_v14  ;;  %2615 = vmatprep.mubr.msk.bf16.mxu0 %vm561_vm5, %v2315_v15 }
  0x9d   : > { %2666 = vmatpush3.bf16.msra.mxu1 %v3139_v4  ;;  %2535 = vmatprep.mubr.msk.bf16.mxu1 %vm561_vm5, %v3491_v37  ;;  %v1767_v4 = vrot.slane %v3553_v16, 5 }
  0xa3   : > { %2616 = vmatmul.mubr.msk.bf16.gmra.mrb[12].mxu0 %vm561_vm5, %v2346_v30 }
  0xa4   : > { %2536 = vmatmul.mubr.msk.bf16.gmra.mrb[4].mxu1 %vm561_vm5, %v3495_v13  ;;  %2621 = vmatprep.mubr.msk.bf16.mxu0 %vm561_vm5, %v3340_v1  ;;  %v1769_v1 = vrot.slane %v1767_v4, 4 }
  0xa5   : > { %2539 = vmatprep.mubr.msk.bf16.mxu1 %vm561_vm5, %v3507_v57 }
  0xab   : > { %2622 = vmatmul.mubr.msk.bf16.vlgmr.msra.gmra.mrb[0].mxu0 %vm561_vm5, %v3381_v55  ;;  %v1770_v55 = vrot.slane %v338_v23, 5 }
  0xac   : > { %2540 = vmatmul.mubr.msk.bf16.gmra.mrb[8].mxu1 %vm561_vm5, %v3513_v9  ;;  %2625 = vmatprep.mubr.msk.bf16.mxu0 %vm561_vm5, %v3412_v20  ;;  %v1768_v20 = vsel %vm3272_vm8, %v2355_v31, %v1767_v4 }
  0xad   : > { %2543 = vmatprep.mubr.msk.bf16.mxu1 %vm561_vm5, %v3529_v53 }
  0xb3   : > { %2626 = vmatmul.mubr.msk.bf16.gmra.mrb[4].mxu0 %vm561_vm5, %v3422_v44  ;;  %v1771_v44 = vsel %vm3272_vm8, %v1769_v1, %v1770_v55 }
  0xb4   : > { %2544 = vmatmul.mubr.msk.bf16.gmra.mrb[12].mxu1 %vm561_vm5, %v3540_v58  ;;  %2629 = vmatprep.mubr.msk.bf16.mxu0 %vm561_vm5, %v3451_v17 }
  0xb5   : > { %2557 = vmatprep.mubr.msk.bf16.mxu1 %vm561_vm5, %v3354_v22  ;;  %v2357_v22 = vcombine.low %v1768_v20, %v1771_v44 }
  0xbb   : > { %2630 = vmatmul.mubr.msk.bf16.gmra.mrb[8].mxu0 %vm561_vm5, %v3457_v25 }
  0xbc   : > { %2558 = vmatmul.mubr.msk.bf16.vlgmr.msra.gmra.mrb[8].mxu1 %vm561_vm5, %v3383_v59  ;;  %2633 = vmatprep.mubr.msk.bf16.mxu0 %vm561_vm5, %v3487_v33 }
  0xbd   : > { %2561 = vmatprep.mubr.msk.bf16.mxu1 %vm561_vm5, %v3420_v52 }
  0xc3   : > { %2634 = vmatmul.mubr.msk.bf16.gmra.mrb[12].mxu0 %vm561_vm5, %v2357_v22 }
  0xc4   : > { %2562 = vmatmul.mubr.msk.bf16.gmra.mrb[12].mxu1 %vm561_vm5, %v2315_v15 }
 0x16f   : > { %v2533_v17 = vpop.f32.mrb[0].mxu1 }
 0x170   : > { %v1131_v25 = vpop.f32.mrb[1].mxu1 }
 0x171   : > { %v2534_v59 = vpop.f32.mrb[2].mxu1 }
 0x172   : > { %v1134_v14 = vpop.f32.mrb[3].mxu1 }
 0x177   : > { %v2537_v39 = vpop.f32.mrb[4].mxu1 }
 0x178   : > { %v1147_v49 = vpop.f32.mrb[5].mxu1 }
 0x179   : > { %v2538_v33 = vpop.f32.mrb[6].mxu1 }
 0x17a   : > { %v1150_v37 = vpop.f32.mrb[7].mxu1 }
 0x17e   : > { %v2623_v13 = vpop.f32.mrb[0].mxu0 }
 0x17f   : > { %v2667_v57 = vadd.f32 %v2623_v13, %v2533_v17  ;;  %v1817_v52 = vpop.f32.mrb[1].mxu0 }
 0x180   : > { %v2668_v62 = vadd.f32 %v1817_v52, %v1131_v25  ;;  %v2624_v9 = vpop.f32.mrb[2].mxu0 }
 0x181   : > { %v2669_v24 = vadd.f32 %v2624_v9, %v2534_v59  ;;  %v1820_v53 = vpop.f32.mrb[3].mxu0  ;;  %v1905_v58 = vadd.f32 %v2667_v57, %v3653_v0 }
 0x182   : > { %v1903_v34 = vadd.f32 %v2668_v62, %v3653_v0  ;;  %v2670_v40 = vadd.f32 %v1820_v53, %v1134_v14 }
 0x183   : > { %v1906_v21 = vadd.f32 %v2669_v24, %v3653_v0  ;;  %v1921_v41 = vmax.f32 %v1905_v58, 0.0 }
 0x184   : > { %v1919_v16 = vmax.f32 %v1903_v34, 0.0  ;;  %v1904_v36 = vadd.f32 %v2670_v40, %v3653_v0 }
 0x185   : > { %v1922_v48 = vmax.f32 %v1906_v21, 0.0  ;;  %v1940_v63 = vsel %vm1936_vm9, %v1921_v41, 0.0 }
 0x186   : > { %v1920_v2 = vmax.f32 %v1904_v36, 0.0  ;;  %v2627_v8 = vpop.f32.mrb[4].mxu0  ;;  %v1937_v47 = vsel %vm1936_vm9, %v1919_v16, 0.0 }
 0x187   : > { %v2671_v38 = vadd.f32 %v2627_v8, %v2537_v39  ;;  %v1833_v42 = vpop.f32.mrb[5].mxu0  ;;  %v1942_v60 = vsel %vm1936_vm9, %v1922_v48, 0.0 }
 0x188   : > { %v1938_v54 = vsel %vm1936_vm9, %v1920_v2, 0.0  ;;  %v2672_v45 = vadd.f32 %v1833_v42, %v1147_v49  ;;  %v2628_v50 = vpop.f32.mrb[6].mxu0 }
 0x189   : > { %v1939_v56 = vadd.f32 %v1938_v54, %v1937_v47  ;;  %v2673_v51 = vadd.f32 %v2628_v50, %v2538_v33  ;;  %v1836_v10 = vpop.f32.mrb[7].mxu0  ;;  %v1909_v3 = vadd.f32 %v2671_v38, %v3653_v0 }
 0x18a   : > { %v1907_v12 = vadd.f32 %v2672_v45, %v3653_v0  ;;  %v2674_v46 = vadd.f32 %v1836_v10, %v1150_v37 }
 0x18b   : > { %v1941_v27 = vadd.f32 %v1940_v63, %v1939_v56  ;;  %v1910_v18 = vadd.f32 %v2673_v51, %v3653_v0  ;;  %v1925_v35 = vmax.f32 %v1909_v3, 0.0 }
 0x18c   : > { %v1923_v43 = vmax.f32 %v1907_v12, 0.0  ;;  %v1908_v19 = vadd.f32 %v2674_v46, %v3653_v0 }
 0x18d   : > { %v1943_v23 = vadd.f32 %v1942_v60, %v1941_v27  ;;  %v1926_v5 = vmax.f32 %v1910_v18, 0.0  ;;  %v1948_v20 = vsel %vm1936_vm9, %v1925_v35, 0.0 }
 0x18e   : > { %v1944_v26 = vsel %vm1936_vm9, %v1923_v43, 0.0  ;;  %v1924_v11 = vmax.f32 %v1908_v19, 0.0  ;;  %v2631_v32 = vpop.f32.mrb[8].mxu0 }
 0x18f   : > { %v1945_v7 = vadd.f32 %v1944_v26, %v1943_v23  ;;  %v2559_v15 = vpop.f32.mrb[8].mxu1  ;;  %v1849_v28 = vpop.f32.mrb[9].mxu0  ;;  %v1950_v39 = vsel %vm1936_vm9, %v1926_v5, 0.0 }
 0x190   : > { %v1946_v6 = vsel %vm1936_vm9, %v1924_v11, 0.0  ;;  %v2675_v61 = vadd.f32 %v2631_v32, %v2559_v15  ;;  %v1311_v29 = vpop.f32.mrb[9].mxu1  ;;  %v2632_v30 = vpop.f32.mrb[10].mxu0 }
 0x191   : > { %v1947_v4 = vadd.f32 %v1946_v6, %v1945_v7  ;;  %v2676_v31 = vadd.f32 %v1849_v28, %v1311_v29  ;;  %v2560_v1 = vpop.f32.mrb[10].mxu1  ;;  %v1852_v55 = vpop.f32.mrb[11].mxu0  ;;  %v1935_v6 = vld [vmem:[#allocation2] sm:$0x1] }
 0x192   : > { %v2677_v44 = vadd.f32 %v2632_v30, %v2560_v1  ;;  %v1314_v22 = vpop.f32.mrb[11].mxu1  ;;  %v1913_v25 = vadd.f32 %v2675_v61, %v3653_v0  ;;  %v2891_v30 = vld [vmem:[%s3783_s3] sm:$0xff] (!%p2367_p1)  }
 0x193   : > { %v1949_v17 = vadd.f32 %v1948_v20, %v1947_v4  ;;  %v1911_v59 = vadd.f32 %v2676_v31, %v3653_v0  ;;  %v2678_v14 = vadd.f32 %v1852_v55, %v1314_v22  ;;  %v2998_v4 = vmov (!%p2367_p1), 0.0   ;;  %v2892_v31 = vld [vmem:[%s3783_s3 + $0x8] sm:$0xff] (!%p2367_p1)   ;;  %v2893_v20 = vld [vmem:[%s3785_s5] sm:$0xff] (!%p2367_p1)  }
 0x194   : > { %v1914_v37 = vadd.f32 %v2677_v44, %v3653_v0  ;;  %v1929_v52 = vmax.f32 %v1913_v25, 0.0  ;;  %2637 = vmatprep.subr.bf16.mxu0 (!%p2367_p1), %v2998_v4  ;;  %2645 = vmatprep.subr.bf16.mxu1 (!%p2367_p1), %v2998_v4  ;;  %v2894_v22 = vld [vmem:[%s3785_s5 + $0x8] sm:$0xff] (!%p2367_p1)   ;;  %v2896_v25 = vld [vmem:[%s3785_s5 + $0x18] sm:$0xff] (!%p2367_p1)  }
 0x195   : > { %v1927_v49 = vmax.f32 %v1911_v59, 0.0  ;;  %v1951_v33 = vadd.f32 %v1950_v39, %v1949_v17  ;;  %v1912_v13 = vadd.f32 %v2678_v14, %v3653_v0  ;;  %2638 = vmatpush3.bf16.msra.mxu0 (!%p2367_p1), %v2891_v30  ;;  %2641 = vmatprep.mubr.msk.bf16.mxu0 (!%p2367_p1), %vm2999_vm11, %v2998_v4  ;;  %v2895_v17 = vld [vmem:[%s3785_s5 + $0x10] sm:$0xff] (!%p2367_p1)   ;;  %v2897_v59 = vld [vmem:[%s3785_s5 + $0x20] sm:$0xff] (!%p2367_p1)   ;;  %v2898_v14 = vld [vmem:[%s3785_s5 + $0x28] sm:$0xff] (!%p2367_p1)  }
 0x196   : > { %v2635_v57 = vpop.f32.mrb[12].mxu0  ;;  %v1930_v21 = vmax.f32 %v1914_v37, 0.0  ;;  %v1956_v48 = vsel %vm1936_vm9, %v1929_v52, 0.0  ;;  %2639 = vmatprep.subr.bf16.mxu0 (!%p2367_p1), %v2998_v4  ;;  %2661 = vmatprep.mubr.msk.bf16.mxu1 (!%p2367_p1), %vm2999_vm11, %v2998_v4  ;;  %v2899_v39 = vld [vmem:[%s3785_s5 + $0x30] sm:$0xff] (!%p2367_p1)  }
 0x197   : > { %v1952_v62 = vsel %vm1936_vm9, %v1927_v49, 0.0  ;;  %v1928_v9 = vmax.f32 %v1912_v13, 0.0  ;;  %v2563_v24 = vpop.f32.mrb[12].mxu1  ;;  %v1865_v53 = vpop.f32.mrb[13].mxu0  ;;  %2646 = vmatpush3.bf16.msra.mxu1 (!%p2367_p1), %v2893_v20  ;;  %v2900_v49 = vld [vmem:[%s3785_s5 + $0x38] sm:$0xff] (!%p2367_p1)  }
 0x198   : > { %v1953_v58 = vadd.f32 %v1952_v62, %v1951_v33  ;;  %v2679_v34 = vadd.f32 %v2635_v57, %v2563_v24  ;;  %v1327_v40 = vpop.f32.mrb[13].mxu1  ;;  %v2636_v16 = vpop.f32.mrb[14].mxu0  ;;  %v1958_v51 = vsel %vm1936_vm9, %v1930_v21, 0.0  ;;  %2647 = vmatprep.subr.bf16.mxu1 (!%p2367_p1), %v2998_v4  ;;  %v1988_v33 = vld [vmem:[%s3784_s4] sm:$0x1] (!%p2367_p1) }
 0x199   : > { %v1954_v36 = vsel %vm1936_vm9, %v1928_v9, 0.0  ;;  %v2680_v41 = vadd.f32 %v1865_v53, %v1327_v40  ;;  %v2564_v2 = vpop.f32.mrb[14].mxu1  ;;  %v1868_v8 = vpop.f32.mrb[15].mxu0  ;;  %2640 = vmatpush3.bf16.msra.mxu0 (!%p2367_p1), %v2892_v31  ;;  %v2061_v24 = vld [vmem:[%s3786_s6] sm:$0x1] (!%p2367_p1) }
 0x19a   : > { %v1955_v38 = vadd.f32 %v1954_v36, %v1953_v58  ;;  %v2681_v42 = vadd.f32 %v2636_v16, %v2564_v2  ;;  %v1330_v47 = vpop.f32.mrb[15].mxu1  ;;  %v1917_v54 = vadd.f32 %v2679_v34, %v3653_v0 }
 0x19b   : > { %v1915_v45 = vadd.f32 %v2680_v41, %v3653_v0  ;;  %v2682_v50 = vadd.f32 %v1868_v8, %v1330_v47  ;;  %2648 = vmatpush3.bf16.msra.mxu1 (!%p2367_p1), %v2894_v22 }
 0x19c   : > { %v1957_v56 = vadd.f32 %v1956_v48, %v1955_v38  ;;  %v1918_v63 = vadd.f32 %v2681_v42, %v3653_v0  ;;  %v1933_v46 = vmax.f32 %v1917_v54, 0.0  ;;  %2649 = vmatprep.subr.bf16.mxu1 (!%p2367_p1), %v2998_v4 }
 0x19d   : > { %v1931_v10 = vmax.f32 %v1915_v45, 0.0  ;;  %v1916_v3 = vadd.f32 %v2682_v50, %v3653_v0 }
 0x19e   : > { %v1959_v12 = vadd.f32 %v1958_v51, %v1957_v56  ;;  %v1934_v18 = vmax.f32 %v1918_v63, 0.0  ;;  %v1964_v35 = vsel %vm1936_vm9, %v1933_v46, 0.0 }
 0x19f   : > { %v1960_v27 = vsel %vm1936_vm9, %v1931_v10, 0.0  ;;  %v1932_v60 = vmax.f32 %v1916_v3, 0.0  ;;  %2650 = vmatpush3.bf16.msra.mxu1 (!%p2367_p1), %v2895_v17 }
 0x1a0   : > { %v1961_v43 = vadd.f32 %v1960_v27, %v1959_v12  ;;  %v1966_v11 = vsel %vm1936_vm9, %v1934_v18, 0.0  ;;  %2651 = vmatprep.subr.bf16.mxu1 (!%p2367_p1), %v2998_v4 }
 0x1a1   : > { %v1962_v19 = vsel %vm1936_vm9, %v1932_v60, 0.0 }
 0x1a2   : > { %v1963_v23 = vadd.f32 %v1962_v19, %v1961_v43 }
 0x1a3   : > { %2652 = vmatpush3.bf16.msra.mxu1 (!%p2367_p1), %v2896_v25 }
 0x1a4   : > { %v1965_v26 = vadd.f32 %v1964_v35, %v1963_v23  ;;  %2653 = vmatprep.subr.bf16.mxu1 (!%p2367_p1), %v2998_v4 }
 0x1a6   : > { %v1967_v32 = vadd.f32 %v1966_v11, %v1965_v26 }
 0x1a7   : > { %2654 = vmatpush3.bf16.msra.mxu1 (!%p2367_p1), %v2897_v59 }
 0x1a8   : > { %v1968_v7 = vrot.slane %v1967_v32, 4  ;;  %2655 = vmatprep.subr.bf16.mxu1 (!%p2367_p1), %v2998_v4 }
 0x1aa   : > { %v1969_v15 = vadd.f32 %v1968_v7, %v1967_v32 }
 0x1ab   : > { %2656 = vmatpush3.bf16.msra.mxu1 (!%p2367_p1), %v2898_v14 }
 0x1ac   : > { %v1970_v28 = vrot.slane %v1969_v15, 2  ;;  %2657 = vmatprep.subr.bf16.mxu1 (!%p2367_p1), %v2998_v4 }
 0x1ae   : > { %v1971_v0 = vadd.f32 %v1970_v28, %v1969_v15 }
 0x1af   : > { %2658 = vmatpush3.bf16.msra.mxu1 (!%p2367_p1), %v2899_v39 }
 0x1b0   : > { %v1972_v5 = vrot.slane %v1971_v0, 1  ;;  %1980 = sbr.rel (%p2367_p1) target bundleno = 881 (0x371), region = 56  ;;  %2659 = vmatprep.subr.bf16.mxu1 (!%p2367_p1), %v2998_v4 }
 0x1b2   : > { %v1973_v61 = vadd.f32 %v1972_v5, %v1971_v0 }
 0x1b3   : > { %2660 = vmatpush3.bf16.msra.mxu1 (!%p2367_p1), %v2900_v49 }
 0x1b4   : > { %v1974_v29 = vadd.f32 %v1973_v61, %v1935_v6 }
 0x1b6   : > { %1976 = vst.msk [vmem:[#allocation2] sm:$0x1] %vm1975_vm10, %v1974_v29 }
 0x1bd   : > { %v1981_v1 = vld [vmem:[#allocation2] sm:$0x1] }
 0x1be   : > { %v1982_v55 = vmul.f32 0.00390625, %v1981_v1 }
 0x1c0   : > { %v1983_v44 = vpack.c.bf16 %v1982_v55, %v1982_v55 }
 0x1c2   : > { %2642 = vmatmul.mubr.msk.bf16.vlgmr.msra.gmra.mrb[0].mxu0 %vm1936_vm9, %v1983_v44 }
 0x295   : > { %v2038_v37 = vpop.f32.mrb[0].mxu0 }
 0x296   : > { %v2039_v13 = vadd.f32 %v2038_v37, %v1988_v33  ;;  %v2643_v57 = vpop.f32.mrb[1].mxu0 }
 0x297   : > { %v2041_v52 = vpop.f32.mrb[2].mxu0 }
 0x298   : > { %v2044_v62 = vpack.c.bf16 %v2039_v13, %v2039_v13  ;;  %v2644_v9 = vpop.f32.mrb[3].mxu0 }
 0x29a   : > { %2662 = vmatmul.mubr.bf16.vlgmr.msra.gmra.mrb[0].mxu1 %v2044_v62 }
 0x36d   : > { %v2144_v53 = vpop.f32.mrb[0].mxu1 }
 0x36e   : > { %v2145_v58 = vadd.f32 %v2144_v53, %v2061_v24  ;;  %v2663_v34 = vpop.f32.mrb[1].mxu1 }
 0x36f   : > { %v2147_v40 = vpop.f32.mrb[2].mxu1 }
 0x370   : > { %2150 = vst [vmem:[%s3122_s12] sm:$0x1] %v2145_v58  ;;  %v2664_v16 = vpop.f32.mrb[3].mxu1 }
 0x371 PF: > { %s2379_s21 = sshll.u32 %s2983_s28, 4  ;;  %s2164_s23 = sshll.u32 %s3122_s12, 4  ;;  %s2165_s23 = int_to_ptr.vmem [resolvable:$true] %s2164_s23 }
 0x372   : > { %s3730_s27 = scalar_lea.hbm %s3787_s7, %s2379_s21  ;;  %s2152_s9 = scalar_lea.sflag [#allocation4], %s291_s18 }
 0x373   : > { %s2901_s10 = scalar_lea.vmem %s2165_s23, 16  ;;  %s3000_s16 = smov [#allocation3]  }
 0x374   : > { %p2902_p2 = scmp.ne.s32.totalorder %s2165_s23, %s2901_s10  ;;  %s2905_s15 = sshll.u32 %s3000_s16, 4  ;;  %s2906_s15 = int_to_ptr.vmem [resolvable:$false] %s2905_s15 }
 0x375   : > { %s2907_s19 = scalar_lea.vmem %s2906_s15, 32  ;;  %p2908_p6 = scmp.lt.s32.totalorder %s2165_s23, %s2906_s15 }
 0x376   : > { %p2903_p4 = pnand %p2902_p2, %p3090_p3  ;;  %p2909_p7 = scmp.lt.s32.totalorder %s2907_s19, %s2901_s10 }
 0x378   : > { %p2904_p5 = pneg %p2903_p4  ;;  %p2910_p8 = por %p2909_p7, %p2908_p6 }
 0x37a   : > { %p2911_p10 = pnand %p2910_p8, %p2904_p5 }
 0x37c   : > { %2914 = shalt.err (!%p2911_p10)
}
 0x37d   : > { %s2915_s28 = scalar_lea.hbm %s3730_s27, 16  ;;  %s2919_s20 = scalar_lea.hbm %s3787_s7, 32 }
 0x37e   : > { %p2916_p11 = scmp.ne.s32.totalorder %s3730_s27, %s2915_s28  ;;  %p2920_p0 = scmp.lt.u32.totalorder %s3730_s27, %s3787_s7 }
 0x37f   : > { %p2921_p1 = scmp.lt.u32.totalorder %s2919_s20, %s2915_s28  ;;  %p2923_p4 = scmp.lt.u32.totalorder %s2915_s28, %s3730_s27 }
 0x380   : > { %p2917_p12 = pnand %p2916_p11, %p3090_p3 }
 0x381   : > { %p2922_p2 = por %p2921_p1, %p2920_p0 }
 0x382   : > { %p2918_p13 = pneg %p2917_p12 }
 0x383   : > { %p2924_p5 = por %p2923_p4, %p2922_p2 }
 0x385   : > { %p2925_p6 = pnand %p2924_p5, %p2918_p13 }
 0x387   : > { %2928 = shalt.err (!%p2925_p6)
}
 0x388   : > { %2807 = dma.vmem_to_hbm [thread:$0]  (%p3090_p3), %s2165_s23, 16, %s3730_s27, %s2152_s9  }
 0x389 PF: > { %p2813_p7 = scmp.ge.s32.totalorder %s2995_s8, 2  ;;  %s2176_s22 = sand.u32 1, %s2967_s24  }
 0x38a   : > { %s2177_s10 = scalar_lea.sflag [#allocation4], %s2176_s22 }
 0x38b   : > { %p2810_p8 = pnand %p2813_p7, %p3100_p9 }
 0x38d   : > { %2962 = dma.done.wait (!%p2810_p8), %s2177_s10, 16  }
 0x38e   : > { %2964 = vsyncadd (!%p2810_p8), %s2177_s10, 4294967280  ;;  %s20_s8 = sadd.s32 1, %s2995_s8   ;;  %s3797_s13 = sld [smem:[#allocation6_spill]] }
 0x38f   : > { %p17_p10 = scmp.ge.s32.totalorder %s20_s8, 6   ;;  %s3798_s23 = sld [smem:[#allocation7_spill]] }
 0x390   : > { %s3799_s24 = smov %s2971_s25  ;;  %s3800_s25 = smov %s2975_s26 }
 0x391   : > { %s3801_s26 = smov %s3108_s17  ;;  %s3802_s27 = smov %s2987_s29 }
 0x392   : > { %s3803_s28 = smov %s2991_s30  ;;  %19 = sbr.rel (!%p17_p10) target bundleno = 5 (0x5), region = 99 }
 0x394   : > { %s3804_s29 = smov %s3797_s13 }
 0x395   : > { %s3805_s30 = smov %s3798_s23 }
 0x399   :  { %2181 = vsyncpa [#allocation4], 1 }
 0x39a   :  { %2183 = vsyncpa [#allocation4 + $0x1], 1 }

</bundles_post_ra>
